<compile_context>
chip_gen: v7x
topology: tpu7x:2x2x1
jax: 0.10.0
libtpu: 0.0.40
codegen_flags: <defaults>
</compile_context>

<pallas_src>
import jax
import jax.numpy as jnp
from jax.experimental import pallas as pl
from jax.experimental.pallas import tpu as pltpu


def _mean_pool_kernel(src_ref, seq_ref, seq_e_ref,
                      w1s_ref, w1e_ref, w1x_ref, b1_ref,
                      w2_ref, b2_ref, out_ref):
    # --- sum over the sequence axis (1/L already folded into w1s/w1e) ---------
    sum_seq = jnp.sum(seq_ref[...].astype(jnp.float32), axis=1)    # [TB, F]
    sum_e = jnp.sum(seq_e_ref[...].astype(jnp.float32), axis=1)    # [TB, E]
    src = src_ref[...].astype(jnp.float32)                         # [TB, F]

    # --- fc1 on cat([mean_seq, mean_e, src], -1), decomposed + bias + ReLU ----
    h = (jnp.dot(sum_seq, w1s_ref[...], preferred_element_type=jnp.float32)
         + jnp.dot(sum_e, w1e_ref[...], preferred_element_type=jnp.float32)
         + jnp.dot(src, w1x_ref[...], preferred_element_type=jnp.float32)
         + b1_ref[...])
    h = jnp.maximum(h, 0.0)                                        # ReLU

    # --- fc2 -------------------------------------------------------------------
    out = jnp.dot(h, w2_ref[...], preferred_element_type=jnp.float32) + b2_ref[...]
    out_ref[...] = out.astype(out_ref.dtype)


def mean_pool_forward(src, src_t, seq, seq_t, seq_e, mask, params, *,
                      batch_tile=512):
    """MeanPool.forward.  src_t, seq_t, mask are accepted for signature parity
    but are unused by the reference forward.  Returns (output, None)."""
    del src_t, seq_t, mask
    w1, b1, w2, b2 = params["w1"], params["b1"], params["w2"], params["b2"]
    B, L, F = seq.shape
    E = seq_e.shape[2]

    # W1 is stored input-major ([2F+E, F]); split its rows to match
    # cat([mean(seq), mean(seq_e), src], -1).  Fold 1/L into the slices that
    # multiply the pooled sums (one-time weight transform, not an activation
    # pre-scale).
    inv_l = jnp.float32(1.0 / L)
    w1_seq = w1[:F] * inv_l            # [F, F]
    w1_e = w1[F:F + E] * inv_l         # [E, F]
    w1_src = w1[F + E:]                # [F, F]
    b1_2d = b1.reshape(1, F)
    b2_2d = b2.reshape(1, F)

    # Batch tile: multiple of 8 (sublane alignment) when B allows, else the
    # full (tiny) batch.  Capped so 2 streams x 2 buffers stays far below the
    # scoped-VMEM default on every generation.
    if B >= 8:
        tb = max(8, (min(batch_tile, B) // 8) * 8)
    else:
        tb = B
    grid = (pl.cdiv(B, tb),)

    # Advisory cost hint: mem-bound, trivial FLOPs.
    bytes_accessed = 4 * (B * L * (F + E) + 2 * B * F
                          + (2 * F + E) * F + F * F + 2 * F)
    flops = B * L * (F + E) + 2 * B * F * (2 * F + E) + 2 * B * F * F

    out = pl.pallas_call(
        _mean_pool_kernel,
        out_shape=jax.ShapeDtypeStruct((B, F), jnp.float32),
        grid=grid,
        in_specs=[
            # Streaming per-batch tiles (double-buffered by the pipeline).
            pl.BlockSpec((tb, F), lambda i: (i, 0)),        # src
            pl.BlockSpec((tb, L, F), lambda i: (i, 0, 0)),  # seq
            pl.BlockSpec((tb, L, E), lambda i: (i, 0, 0)),  # seq_e
            # Weights/biases: constant block index -> fetched once, VMEM-resident.
            pl.BlockSpec((F, F), lambda i: (0, 0)),         # w1_seq (pre-scaled)
            pl.BlockSpec((E, F), lambda i: (0, 0)),         # w1_e   (pre-scaled)
            pl.BlockSpec((F, F), lambda i: (0, 0)),         # w1_src
            pl.BlockSpec((1, F), lambda i: (0, 0)),         # b1
            pl.BlockSpec((F, F), lambda i: (0, 0)),         # w2
            pl.BlockSpec((1, F), lambda i: (0, 0)),         # b2
        ],
        out_specs=pl.BlockSpec((tb, F), lambda i: (i, 0)),
        compiler_params=pltpu.CompilerParams(
            dimension_semantics=("parallel",)),
        cost_estimate=pl.CostEstimate(
            flops=flops, transcendentals=0, bytes_accessed=bytes_accessed),
    )(src, seq, seq_e, w1_seq, w1_e, w1_src, b1_2d, w2, b2_2d)
    return out, None


def _reference(src, seq, seq_e, w1, b1, w2, b2):
    """Pure-JAX mirror of the PyTorch forward (weights already [in, out])."""
    hn = jnp.concatenate([seq, seq_e], axis=2).mean(axis=1)
    x = jnp.concatenate([hn, src], axis=1)
    h = jnp.maximum(x @ w1 + b1, 0.0)
    return h @ w2 + b2


def _run_case(key, B, L, feat_dim, edge_dim, batch_tile):
    d_in1 = 2 * feat_dim + edge_dim
    ks = jax.random.split(key, 8)
    src = jax.random.normal(ks[0], (B, feat_dim), dtype=jnp.float32)
    seq = jax.random.normal(ks[1], (B, L, feat_dim), dtype=jnp.float32)
    seq_e = jax.random.normal(ks[2], (B, L, edge_dim), dtype=jnp.float32)
    src_t = jax.random.normal(ks[3], (B, 1), dtype=jnp.float32)   # unused
    seq_t = jax.random.normal(ks[4], (B, L), dtype=jnp.float32)   # unused
    mask = jnp.zeros((B, L), dtype=jnp.float32)                   # unused

    # Parameters (xavier-normal-like weights, stored [in, out]; small biases).
    w1 = jax.random.normal(ks[5], (d_in1, feat_dim), dtype=jnp.float32) * (
        (2.0 / (d_in1 + feat_dim)) ** 0.5)
    w2 = jax.random.normal(ks[6], (feat_dim, feat_dim), dtype=jnp.float32) * (
        (2.0 / (feat_dim + feat_dim)) ** 0.5)
    b1, b2 = jnp.split(
        jax.random.normal(ks[7], (2 * feat_dim,), dtype=jnp.float32) * 0.01, 2)
    params = {"w1": w1, "b1": b1, "w2": w2, "b2": b2}

    out, aux = mean_pool_forward(src, src_t, seq, seq_t, seq_e, mask, params,
                                 batch_tile=batch_tile)
    out = jax.block_until_ready(out)
    ref = _reference(src, seq, seq_e, w1, b1, w2, b2)

    assert aux is None
    assert out.shape == (B, feat_dim), out.shape
    assert out.dtype == jnp.float32, out.dtype
    assert bool(jnp.allclose(out, ref, atol=1e-5, rtol=1e-5)), (
        float(jnp.max(jnp.abs(out - ref))))


if __name__ == "__main__":
    key = jax.random.PRNGKey(0)
    k1, k2 = jax.random.split(key)

    # Small shape matching the module's intent (single grid step).
    _run_case(k1, B=2, L=8, feat_dim=32, edge_dim=32, batch_tile=512)

    # Larger batch exercising the pipelined grid path, including a partial
    # final tile (B=20 with batch_tile=8 -> grid of 3 steps).
    _run_case(k2, B=20, L=8, feat_dim=32, edge_dim=32, batch_tile=8)

    print("KERNEL_OK")
</pallas_src>

<mosaic_0001>
module attributes {stable_mosaic.version = 11 : i64} {
  func.func @_mean_pool_kernel(%arg0: i32, %arg1: memref<2x32xf32, #tpu.memory_space<vmem>>, %arg2: memref<2x8x32xf32, #tpu.memory_space<vmem>>, %arg3: memref<2x8x32xf32, #tpu.memory_space<vmem>>, %arg4: memref<32x32xf32, #tpu.memory_space<vmem>>, %arg5: memref<32x32xf32, #tpu.memory_space<vmem>>, %arg6: memref<32x32xf32, #tpu.memory_space<vmem>>, %arg7: memref<1x32xf32, #tpu.memory_space<vmem>>, %arg8: memref<32x32xf32, #tpu.memory_space<vmem>>, %arg9: memref<1x32xf32, #tpu.memory_space<vmem>>, %arg10: memref<2x32xf32, #tpu.memory_space<vmem>>) attributes {dimension_semantics = [#tpu.dimension_semantics<parallel>], iteration_bounds = array<i64: 1>, scalar_prefetch = 0 : i64, scratch_operands = 0 : i64, tpu.core_type = #tpu.core_type<tc>, window_params = [{transform_indices = @transform_0, window_bounds = array<i64: 2, 32>}, {transform_indices = @transform_1, window_bounds = array<i64: 2, 8, 32>}, {transform_indices = @transform_2, window_bounds = array<i64: 2, 8, 32>}, {pipeline_mode = #tpu.pipeline_mode<synchronous>, transform_indices = @transform_3, window_bounds = array<i64: 32, 32>}, {pipeline_mode = #tpu.pipeline_mode<synchronous>, transform_indices = @transform_4, window_bounds = array<i64: 32, 32>}, {pipeline_mode = #tpu.pipeline_mode<synchronous>, transform_indices = @transform_5, window_bounds = array<i64: 32, 32>}, {pipeline_mode = #tpu.pipeline_mode<synchronous>, transform_indices = @transform_6, window_bounds = array<i64: 1, 32>}, {pipeline_mode = #tpu.pipeline_mode<synchronous>, transform_indices = @transform_7, window_bounds = array<i64: 32, 32>}, {pipeline_mode = #tpu.pipeline_mode<synchronous>, transform_indices = @transform_8, window_bounds = array<i64: 1, 32>}, {transform_indices = @transform_9, window_bounds = array<i64: 2, 32>}]} {
    %c0 = arith.constant 0 : index
    %c0_0 = arith.constant 0 : index
    %c0_1 = arith.constant 0 : index
    %0 = vector.load %arg2[%c0, %c0_0, %c0_1] : memref<2x8x32xf32, #tpu.memory_space<vmem>>, vector<2x8x32xf32>
    %cst = arith.constant dense<0.000000e+00> : vector<2x32xf32>
    %1 = vector.multi_reduction <add>, %0, %cst [1] : vector<2x8x32xf32> to vector<2x32xf32>
    %c0_2 = arith.constant 0 : index
    %c0_3 = arith.constant 0 : index
    %c0_4 = arith.constant 0 : index
    %2 = vector.load %arg3[%c0_2, %c0_3, %c0_4] : memref<2x8x32xf32, #tpu.memory_space<vmem>>, vector<2x8x32xf32>
    %cst_5 = arith.constant dense<0.000000e+00> : vector<2x32xf32>
    %3 = vector.multi_reduction <add>, %2, %cst_5 [1] : vector<2x8x32xf32> to vector<2x32xf32>
    %c0_6 = arith.constant 0 : index
    %c0_7 = arith.constant 0 : index
    %4 = vector.load %arg1[%c0_6, %c0_7] : memref<2x32xf32, #tpu.memory_space<vmem>>, vector<2x32xf32>
    %c0_8 = arith.constant 0 : index
    %c0_9 = arith.constant 0 : index
    %5 = vector.load %arg4[%c0_8, %c0_9] : memref<32x32xf32, #tpu.memory_space<vmem>>, vector<32x32xf32>
    %cst_10 = arith.constant dense<0.000000e+00> : vector<2x32xf32>
    %6 = tpu.matmul %1, %5, %cst_10 {dimension_numbers = #tpu.dot_dimension_numbers<[1], [0], [0], [1], [0, 0, 1, 1], [], []>} : vector<2x32xf32>, vector<32x32xf32>, vector<2x32xf32> -> vector<2x32xf32>
    %c0_11 = arith.constant 0 : index
    %c0_12 = arith.constant 0 : index
    %7 = vector.load %arg5[%c0_11, %c0_12] : memref<32x32xf32, #tpu.memory_space<vmem>>, vector<32x32xf32>
    %cst_13 = arith.constant dense<0.000000e+00> : vector<2x32xf32>
    %8 = tpu.matmul %3, %7, %cst_13 {dimension_numbers = #tpu.dot_dimension_numbers<[1], [0], [0], [1], [0, 0, 1, 1], [], []>} : vector<2x32xf32>, vector<32x32xf32>, vector<2x32xf32> -> vector<2x32xf32>
    %9 = arith.addf %6, %8 : vector<2x32xf32>
    %c0_14 = arith.constant 0 : index
    %c0_15 = arith.constant 0 : index
    %10 = vector.load %arg6[%c0_14, %c0_15] : memref<32x32xf32, #tpu.memory_space<vmem>>, vector<32x32xf32>
    %cst_16 = arith.constant dense<0.000000e+00> : vector<2x32xf32>
    %11 = tpu.matmul %4, %10, %cst_16 {dimension_numbers = #tpu.dot_dimension_numbers<[1], [0], [0], [1], [0, 0, 1, 1], [], []>} : vector<2x32xf32>, vector<32x32xf32>, vector<2x32xf32> -> vector<2x32xf32>
    %12 = arith.addf %9, %11 : vector<2x32xf32>
    %c0_17 = arith.constant 0 : index
    %c0_18 = arith.constant 0 : index
    %13 = vector.load %arg7[%c0_17, %c0_18] : memref<1x32xf32, #tpu.memory_space<vmem>>, vector<1x32xf32>
    %14 = vector.broadcast %13 : vector<1x32xf32> to vector<2x32xf32>
    %15 = arith.addf %12, %14 : vector<2x32xf32>
    %cst_19 = arith.constant 0.000000e+00 : f32
    %16 = vector.broadcast %cst_19 : f32 to vector<2x32xf32>
    %17 = arith.maximumf %15, %16 : vector<2x32xf32>
    %c0_20 = arith.constant 0 : index
    %c0_21 = arith.constant 0 : index
    %18 = vector.load %arg8[%c0_20, %c0_21] : memref<32x32xf32, #tpu.memory_space<vmem>>, vector<32x32xf32>
    %cst_22 = arith.constant dense<0.000000e+00> : vector<2x32xf32>
    %19 = tpu.matmul %17, %18, %cst_22 {dimension_numbers = #tpu.dot_dimension_numbers<[1], [0], [0], [1], [0, 0, 1, 1], [], []>} : vector<2x32xf32>, vector<32x32xf32>, vector<2x32xf32> -> vector<2x32xf32>
    %c0_23 = arith.constant 0 : index
    %c0_24 = arith.constant 0 : index
    %20 = vector.load %arg9[%c0_23, %c0_24] : memref<1x32xf32, #tpu.memory_space<vmem>>, vector<1x32xf32>
    %21 = vector.broadcast %20 : vector<1x32xf32> to vector<2x32xf32>
    %22 = arith.addf %19, %21 : vector<2x32xf32>
    %c0_25 = arith.constant 0 : index
    %c0_26 = arith.constant 0 : index
    %23 = vector.load %arg10[%c0_25, %c0_26] : memref<2x32xf32, #tpu.memory_space<vmem>>, vector<2x32xf32>
    tpu.vector_store %arg10[%c0_25, %c0_26], %22 {strides = array<i32>} : memref<2x32xf32, #tpu.memory_space<vmem>>, vector<2x32xf32>,
    return
  }
  func.func @transform_0(%arg0: i32) -> (i32, i32) {
    %c0_i32 = arith.constant 0 : i32
    %c0_i32_0 = arith.constant 0 : i32
    return %arg0, %c0_i32 : i32, i32
  }
  func.func @transform_1(%arg0: i32) -> (i32, i32, i32) {
    %c0_i32 = arith.constant 0 : i32
    %c0_i32_0 = arith.constant 0 : i32
    %c0_i32_1 = arith.constant 0 : i32
    return %arg0, %c0_i32, %c0_i32_0 : i32, i32, i32
  }
  func.func @transform_2(%arg0: i32) -> (i32, i32, i32) {
    %c0_i32 = arith.constant 0 : i32
    %c0_i32_0 = arith.constant 0 : i32
    %c0_i32_1 = arith.constant 0 : i32
    return %arg0, %c0_i32, %c0_i32_0 : i32, i32, i32
  }
  func.func @transform_3(%arg0: i32) -> (i32, i32) {
    %c0_i32 = arith.constant 0 : i32
    %c0_i32_0 = arith.constant 0 : i32
    %c0_i32_1 = arith.constant 0 : i32
    return %c0_i32, %c0_i32_0 : i32, i32
  }
  func.func @transform_4(%arg0: i32) -> (i32, i32) {
    %c0_i32 = arith.constant 0 : i32
    %c0_i32_0 = arith.constant 0 : i32
    %c0_i32_1 = arith.constant 0 : i32
    return %c0_i32, %c0_i32_0 : i32, i32
  }
  func.func @transform_5(%arg0: i32) -> (i32, i32) {
    %c0_i32 = arith.constant 0 : i32
    %c0_i32_0 = arith.constant 0 : i32
    %c0_i32_1 = arith.constant 0 : i32
    return %c0_i32, %c0_i32_0 : i32, i32
  }
  func.func @transform_6(%arg0: i32) -> (i32, i32) {
    %c0_i32 = arith.constant 0 : i32
    %c0_i32_0 = arith.constant 0 : i32
    %c0_i32_1 = arith.constant 0 : i32
    return %c0_i32, %c0_i32_0 : i32, i32
  }
  func.func @transform_7(%arg0: i32) -> (i32, i32) {
    %c0_i32 = arith.constant 0 : i32
    %c0_i32_0 = arith.constant 0 : i32
    %c0_i32_1 = arith.constant 0 : i32
    return %c0_i32, %c0_i32_0 : i32, i32
  }
  func.func @transform_8(%arg0: i32) -> (i32, i32) {
    %c0_i32 = arith.constant 0 : i32
    %c0_i32_0 = arith.constant 0 : i32
    %c0_i32_1 = arith.constant 0 : i32
    return %c0_i32, %c0_i32_0 : i32, i32
  }
  func.func @transform_9(%arg0: i32) -> (i32, i32) {
    %c0_i32 = arith.constant 0 : i32
    %c0_i32_0 = arith.constant 0 : i32
    return %arg0, %c0_i32 : i32, i32
  }
}

</mosaic_0001>

<bundles_post_ra>
// kernel: tpu_custom_call.1
= control target key start
LH: loop header
LB: loop body
LE: loop exit
PB: predicated region body
PF: predicated region fallthrough
CT: control target
= control target key end

     0   :  { %14 = vsyncpa [#allocation3], 0  ;;  %s1010_s0 = inlined_call_operand.hbm [shape: f32[2,32], index: 0, kind: input, shape index: {}]   ;;  %s1011_s1 = inlined_call_operand.hbm [shape: f32[2,8,32], index: 1, kind: input, shape index: {}]   ;;  %s1012_s2 = inlined_call_operand.hbm [shape: f32[2,8,32], index: 2, kind: input, shape index: {}]   ;;  %s1013_s3 = inlined_call_operand.hbm [shape: f32[32,32], index: 3, kind: input, shape index: {}]   ;;  %s1014_s4 = inlined_call_operand.hbm [shape: f32[32,32], index: 4, kind: input, shape index: {}]   ;;  %s1015_s5 = inlined_call_operand.hbm [shape: f32[32,32], index: 5, kind: input, shape index: {}]   ;;  %s1016_s6 = inlined_call_operand.vmem [shape: f32[1,32], index: 6, kind: input, shape index: {}]   ;;  %s1017_s7 = inlined_call_operand.hbm [shape: f32[32,32], index: 7, kind: input, shape index: {}]   ;;  %s1018_s8 = inlined_call_operand.vmem [shape: f32[1,32], index: 8, kind: input, shape index: {}]   ;;  %s1019_s9 = inlined_call_operand.hbm [shape: f32[2,32], index: 9, kind: output, shape index: {}]  }
   0x1   :  { %15 = vsyncpa [#allocation6], 0 }
   0x2   :  { %16 = vsyncpa [#allocation9], 0 }
   0x3   :  { %17 = vsyncpa [#allocation12], 0 }
   0x4   :  { %18 = vsyncpa [#allocation4], 0  ;;  %s803_s30 = smov [#allocation5]   ;;  %s617_s13 = scalar_lea.hbm %s1011_s1, 256 }
   0x5   :  { %s34_s10 = sshll.u32 %s803_s30, 4  ;;  %p618_p0 = scmp.ne.s32.totalorder %s1011_s1, %s617_s13  ;;  %s35_s10 = int_to_ptr.vmem [resolvable:$true] %s34_s10 }
   0x6   :  { %p621_p1 = scmp.lt.u32.totalorder %s617_s13, %s1011_s1 }
   0x8   :  { %p623_p2 = pnand %p621_p1, %p618_p0 }
   0xa   :  { %626 = shalt.err (!%p623_p2)
}
   0xb   :  { %s627_s18 = scalar_lea.vmem %s35_s10, 256  ;;  %p632_p4 = scmp.lt.s32.totalorder %s35_s10, %s35_s10 }
   0xc   :  { %p628_p3 = scmp.ne.s32.totalorder %s35_s10, %s627_s18  ;;  %p633_p5 = scmp.lt.s32.totalorder %s627_s18, %s627_s18 }
   0xe   :  { %p634_p6 = por %p633_p5, %p632_p4 }
  0x10   :  { %p635_p7 = pnand %p634_p6, %p628_p3 }
  0x12   :  { %638 = shalt.err (!%p635_p7)
}
  0x13   :  { %s804_s19 = smov 128   ;;  %s805_s20 = smov 8  }
  0x14   :  { %40 = dma.hbm_to_vmem [thread:$0]  %s1011_s1, 256, %s35_s10, [#allocation6], %s804_s19, %s804_s19, %s805_s20  }
  0x15   :  { %s806_s23 = smov [#allocation8]   ;;  %s807_s25 = smov [#allocation11]  }
  0x16   :  { %s58_s24 = sshll.u32 %s806_s23, 4  ;;  %s82_s26 = sshll.u32 %s807_s25, 4  ;;  %s59_s24 = int_to_ptr.vmem [resolvable:$true] %s58_s24  ;;  %s83_s26 = int_to_ptr.vmem [resolvable:$true] %s82_s26 }
  0x17   :  { %s639_s29 = scalar_lea.hbm %s1013_s3, 512 }
  0x18   :  { %p640_p8 = scmp.ne.s32.totalorder %s1013_s3, %s639_s29  ;;  %p643_p9 = scmp.lt.u32.totalorder %s639_s29, %s1013_s3 }
  0x1a   :  { %p645_p10 = pnand %p643_p9, %p640_p8 }
  0x1c   :  { %648 = shalt.err (!%p645_p10)
}
  0x1d   :  { %s649_s1 = scalar_lea.vmem %s59_s24, 512  ;;  %p654_p12 = scmp.lt.s32.totalorder %s59_s24, %s59_s24 }
  0x1e   :  { %p650_p11 = scmp.ne.s32.totalorder %s59_s24, %s649_s1  ;;  %p655_p13 = scmp.lt.s32.totalorder %s649_s1, %s649_s1 }
  0x20   :  { %p656_p0 = por %p655_p13, %p654_p12 }
  0x22   :  { %p657_p1 = pnand %p656_p0, %p650_p11 }
  0x24   :  { %660 = shalt.err (!%p657_p1)
}
  0x25   :  { %64 = dma.hbm_to_vmem [thread:$0]  %s1013_s3, 512, %s59_s24, [#allocation9], %s804_s19, %s804_s19, %s805_s20  }
  0x26   :  { %s661_s17 = scalar_lea.hbm %s1015_s5, 512 }
  0x27   :  { %p662_p2 = scmp.ne.s32.totalorder %s1015_s5, %s661_s17  ;;  %p665_p3 = scmp.lt.u32.totalorder %s661_s17, %s1015_s5 }
  0x29   :  { %p667_p4 = pnand %p665_p3, %p662_p2 }
  0x2b   :  { %670 = shalt.err (!%p667_p4)
}
  0x2c   :  { %s671_s25 = scalar_lea.vmem %s83_s26, 512  ;;  %p676_p6 = scmp.lt.s32.totalorder %s83_s26, %s83_s26 }
  0x2d   :  { %p672_p5 = scmp.ne.s32.totalorder %s83_s26, %s671_s25  ;;  %p677_p7 = scmp.lt.s32.totalorder %s671_s25, %s671_s25 }
  0x2f   :  { %p678_p8 = por %p677_p7, %p676_p6 }
  0x31   :  { %p679_p9 = pnand %p678_p8, %p672_p5 }
  0x33   :  { %682 = shalt.err (!%p679_p9)
}
  0x34   :  { %88 = dma.hbm_to_vmem [thread:$0]  %s1015_s5, 512, %s83_s26, [#allocation12], %s804_s19, %s804_s19, %s805_s20  }
  0x35   :  { %s808_s27 = smov [#allocation2]   ;;  %s809_s29 = smov [#allocation7]  }
  0x36   :  { %s25_s28 = sshll.u32 %s808_s27, 4  ;;  %s46_s30 = sshll.u32 %s809_s29, 4  ;;  %s26_s28 = int_to_ptr.vmem [resolvable:$true] %s25_s28  ;;  %s47_s30 = int_to_ptr.vmem [resolvable:$true] %s46_s30 }
  0x37   :  { %s683_s13 = scalar_lea.hbm %s1010_s0, 32 }
  0x38   :  { %p684_p10 = scmp.ne.s32.totalorder %s1010_s0, %s683_s13  ;;  %p687_p11 = scmp.lt.u32.totalorder %s683_s13, %s1010_s0 }
  0x3a   :  { %p689_p12 = pnand %p687_p11, %p684_p10 }
  0x3c   :  { %692 = shalt.err (!%p689_p12)
}
  0x3d   :  { %s693_s5 = scalar_lea.vmem %s26_s28, 32  ;;  %p698_p0 = scmp.lt.s32.totalorder %s26_s28, %s26_s28 }
  0x3e   :  { %p694_p13 = scmp.ne.s32.totalorder %s26_s28, %s693_s5  ;;  %p699_p1 = scmp.lt.s32.totalorder %s693_s5, %s693_s5 }
  0x40   :  { %p700_p2 = por %p699_p1, %p698_p0 }
  0x42   :  { %p701_p3 = pnand %p700_p2, %p694_p13 }
  0x44   :  { %704 = shalt.err (!%p701_p3)
}
  0x45   :  { %28 = dma.hbm_to_vmem [thread:$0]  %s1010_s0, 32, %s26_s28, [#allocation3]  }
  0x46   :  { %s705_s21 = scalar_lea.hbm %s1012_s2, 256 }
  0x47   :  { %p706_p4 = scmp.ne.s32.totalorder %s1012_s2, %s705_s21  ;;  %p709_p5 = scmp.lt.u32.totalorder %s705_s21, %s1012_s2 }
  0x49   :  { %p711_p6 = pnand %p709_p5, %p706_p4 }
  0x4b   :  { %714 = shalt.err (!%p711_p6)
}
  0x4c   :  { %s715_s24 = scalar_lea.vmem %s47_s30, 256  ;;  %p720_p8 = scmp.lt.s32.totalorder %s47_s30, %s47_s30 }
  0x4d   :  { %p716_p7 = scmp.ne.s32.totalorder %s47_s30, %s715_s24  ;;  %p721_p9 = scmp.lt.s32.totalorder %s715_s24, %s715_s24 }
  0x4f   :  { %p722_p10 = por %p721_p9, %p720_p8 }
  0x51   :  { %p723_p11 = pnand %p722_p10, %p716_p7 }
  0x53   :  { %726 = shalt.err (!%p723_p11)
}
  0x54   :  { %52 = dma.hbm_to_vmem [thread:$0]  %s1012_s2, 256, %s47_s30, [#allocation6], %s804_s19, %s804_s19, %s805_s20  }
  0x55   :  { %s810_s28 = smov [#allocation10]   ;;  %s811_s11 = smov [#allocation13]  }
  0x56   :  { %s70_s29 = sshll.u32 %s810_s28, 4  ;;  %s96_s12 = sshll.u32 %s811_s11, 4  ;;  %s71_s29 = int_to_ptr.vmem [resolvable:$true] %s70_s29  ;;  %s97_s12 = int_to_ptr.vmem [resolvable:$true] %s96_s12 }
  0x57   :  { %s727_s10 = scalar_lea.hbm %s1014_s4, 512 }
  0x58   :  { %p728_p12 = scmp.ne.s32.totalorder %s1014_s4, %s727_s10  ;;  %p731_p13 = scmp.lt.u32.totalorder %s727_s10, %s1014_s4 }
  0x5a   :  { %p733_p0 = pnand %p731_p13, %p728_p12 }
  0x5c   :  { %736 = shalt.err (!%p733_p0)
}
  0x5d   :  { %s737_s2 = scalar_lea.vmem %s71_s29, 512  ;;  %p742_p2 = scmp.lt.s32.totalorder %s71_s29, %s71_s29 }
  0x5e   :  { %p738_p1 = scmp.ne.s32.totalorder %s71_s29, %s737_s2  ;;  %p743_p3 = scmp.lt.s32.totalorder %s737_s2, %s737_s2 }
  0x60   :  { %p744_p4 = por %p743_p3, %p742_p2 }
  0x62   :  { %p745_p5 = pnand %p744_p4, %p738_p1 }
  0x64   :  { %748 = shalt.err (!%p745_p5)
}
  0x65   :  { %76 = dma.hbm_to_vmem [thread:$0]  %s1014_s4, 512, %s71_s29, [#allocation9], %s804_s19, %s804_s19, %s805_s20  }
  0x66   :  { %s749_s21 = scalar_lea.hbm %s1017_s7, 512 }
  0x67   :  { %p750_p6 = scmp.ne.s32.totalorder %s1017_s7, %s749_s21  ;;  %p753_p7 = scmp.lt.u32.totalorder %s749_s21, %s1017_s7 }
  0x69   :  { %p755_p8 = pnand %p753_p7, %p750_p6 }
  0x6b   :  { %758 = shalt.err (!%p755_p8)
}
  0x6c   :  { %s759_s24 = scalar_lea.vmem %s97_s12, 512  ;;  %p764_p10 = scmp.lt.s32.totalorder %s97_s12, %s97_s12 }
  0x6d   :  { %p760_p9 = scmp.ne.s32.totalorder %s97_s12, %s759_s24  ;;  %p765_p11 = scmp.lt.s32.totalorder %s759_s24, %s759_s24 }
  0x6f   :  { %p766_p12 = por %p765_p11, %p764_p10 }
  0x71   :  { %p767_p13 = pnand %p766_p12, %p760_p9 }
  0x73   :  { %770 = shalt.err (!%p767_p13)
}
  0x74   :  { %102 = dma.hbm_to_vmem [thread:$0]  %s1017_s7, 512, %s97_s12, [#allocation12], %s804_s19, %s804_s19, %s805_s20  }
  0x75   :  { %793 = dma.done.wait [#allocation3], 32  }
  0x76   :  { %794 = vsyncadd [#allocation3], 4294967264 }
  0x77   :  { %795 = dma.done.wait [#allocation6], 512  }
  0x78   :  { %796 = vsyncadd [#allocation6], 4294966784 }
  0x79   :  { %797 = dma.done.wait [#allocation9], 1024  }
  0x7a   :  { %798 = vsyncadd [#allocation9], 4294966272 }
  0x7b   :  { %799 = dma.done.wait [#allocation12], 1024  }
  0x7c   :  { %800 = vsyncadd [#allocation12], 4294966272  ;;  %v812_v0 = vmov 0.0|0.0   ;;  %vm813_vm0 = vmmov 0   ;;  %v814_v1 = vmov 0.0   ;;  %v164_v2 = vld [vmem:[#allocation10] sm:$0xff] }
  0x7d   :  { %580 = vmatprep.subr.bf16.mxu0 %v812_v0  ;;  %586 = vmatprep.subr.bf16.mxu1 %v812_v0  ;;  %v165_v3 = vld [vmem:[#allocation10 + $0x8] sm:$0xff]  ;;  %v160_v4 = vld [vmem:[#allocation8] sm:$0xff]  ;;  %vm128_vm1 = vcmask 261120   ;;  %v166_v7 = vld [vmem:[#allocation10 + $0x10] sm:$0xff]  ;;  %vm170_vm2 = vcmask 1041409   ;;  %s815_s28 = smov [#allocation14]  }
  0x7e   :  { %544 = vmatprep.mubr.msk.f32.mxu0 %vm813_vm0, %v814_v1  ;;  %555 = vmatprep.mubr.msk.f32.mxu1 %vm813_vm0, %v814_v1  ;;  %v581_v5 = vpack.c.bf16 %v165_v3, %v164_v2  ;;  %v161_v6 = vld [vmem:[#allocation8 + $0x8] sm:$0xff]  ;;  %v167_v8 = vld [vmem:[#allocation10 + $0x18] sm:$0xff]  ;;  %v162_v10 = vld [vmem:[#allocation8 + $0x10] sm:$0xff]  ;;  %s498_s29 = sshll.u32 %s815_s28, 4  ;;  %vm490_vm3 = vcmask 254976   ;;  %s499_s29 = int_to_ptr.vmem [resolvable:$true] %s498_s29 }
  0x7f   :  { %v587_v9 = vpack.c.bf16 %v161_v6, %v160_v4  ;;  %v163_v11 = vld [vmem:[#allocation8 + $0x18] sm:$0xff]  ;;  %v143_v12 = vld [vmem:[#allocation7] sm:$0xff]  ;;  %v584_v13 = vpack.c.bf16 %v167_v8, %v166_v7  ;;  %v126_v17 = vld [vmem:[#allocation5] sm:$0xff]  ;;  %s771_s11 = scalar_lea.vmem %s499_s29, 32  ;;  %p776_p1 = scmp.lt.s32.totalorder %s499_s29, %s499_s29 }
  0x80   :  { %582 = vmatpush3.bf16.msra.mxu0 %v581_v5  ;;  %v590_v14 = vpack.c.bf16 %v163_v11, %v162_v10  ;;  %v144_v15 = vld [vmem:[#allocation7 + $0x8] sm:$0xff]  ;;  %v145_v16 = vsel %vm128_vm1, %v143_v12, 0.0  ;;  %v127_v18 = vld [vmem:[#allocation5 + $0x8] sm:$0xff]  ;;  %v129_v21 = vsel %vm128_vm1, %v126_v17, 0.0  ;;  %v319_v39 = vld [vmem:[#allocation11] sm:$0xff]  ;;  %p772_p0 = scmp.ne.s32.totalorder %s499_s29, %s771_s11  ;;  %p777_p2 = scmp.lt.s32.totalorder %s771_s11, %s771_s11 }
  0x81   :  { %588 = vmatpush3.bf16.msra.mxu1 %v587_v9  ;;  %583 = vmatprep.subr.bf16.mxu0 %v812_v0  ;;  %v146_v19 = vrot.slane %v145_v16, 4  ;;  %v152_v20 = vsel %vm128_vm1, %v144_v15, 0.0  ;;  %v136_v22 = vsel %vm128_vm1, %v127_v18, 0.0  ;;  %v130_v24 = vrot.slane %v129_v21, 4  ;;  %v320_v40 = vld [vmem:[#allocation11 + $0x8] sm:$0xff]  ;;  %v321_v49 = vld [vmem:[#allocation11 + $0x10] sm:$0xff] }
  0x82   :  { %589 = vmatprep.subr.bf16.mxu1 %v812_v0  ;;  %v153_v23 = vrot.slane %v152_v20, 4  ;;  %v137_v25 = vrot.slane %v136_v22, 4  ;;  %v593_v48 = vpack.c.bf16 %v320_v40, %v319_v39  ;;  %v322_v50 = vld [vmem:[#allocation11 + $0x18] sm:$0xff]  ;;  %v406_v55 = vld [vmem:[#allocation13] sm:$0xff]  ;;  %v407_v56 = vld [vmem:[#allocation13 + $0x8] sm:$0xff]  ;;  %p778_p3 = por %p777_p2, %p776_p1 }
  0x83   :  { %v147_v26 = vadd.f32 %v146_v19, %v145_v16  ;;  %v131_v28 = vadd.f32 %v130_v24, %v129_v21  ;;  %v596_v53 = vpack.c.bf16 %v322_v50, %v321_v49  ;;  %v159_v54 = vld [vmem:[#allocation2] sm:$0x3]  ;;  %v599_v57 = vpack.c.bf16 %v407_v56, %v406_v55  ;;  %v408_v58 = vld [vmem:[#allocation13 + $0x10] sm:$0xff] }
  0x84   :  { %585 = vmatpush3.bf16.msra.mxu0 %v584_v13  ;;  %v154_v27 = vadd.f32 %v153_v23, %v152_v20  ;;  %v138_v29 = vadd.f32 %v137_v25, %v136_v22  ;;  %v409_v59 = vld [vmem:[#allocation13 + $0x18] sm:$0xff]  ;;  %p779_p4 = pnand %p778_p3, %p772_p0 }
  0x85   :  { %591 = vmatpush3.bf16.msra.mxu1 %v590_v14  ;;  %592 = vmatprep.subr.bf16.mxu0 %v812_v0  ;;  %v148_v30 = vrot.slane %v147_v26, 2  ;;  %v132_v32 = vrot.slane %v131_v28, 2  ;;  %v602_v60 = vpack.c.bf16 %v409_v59, %v408_v58  ;;  %v513_v4 = vld [vmem:[%s1016_s6] ss:$0 sm:$0xff] }
  0x86   :  { %v155_v31 = vrot.slane %v154_v27, 2  ;;  %v139_v33 = vrot.slane %v138_v29, 2  ;;  %598 = vmatprep.subr.bf16.mxu1 %v812_v0 }
  0x87   :  { %v149_v34 = vadd.f32 %v148_v30, %v147_v26  ;;  %v133_v36 = vadd.f32 %v132_v32, %v131_v28 }
  0x88   :  { %v156_v35 = vadd.f32 %v155_v31, %v154_v27  ;;  %v140_v37 = vadd.f32 %v139_v33, %v138_v29 }
  0x89   :  { %v150_v38 = vrot.slane %v149_v34, 1  ;;  %v134_v42 = vrot.slane %v133_v36, 1 }
  0x8a   :  { %v157_v41 = vrot.slane %v156_v35, 1  ;;  %v141_v43 = vrot.slane %v140_v37, 1 }
  0x8b   :  { %v151_v44 = vadd.f32 %v150_v38, %v149_v34  ;;  %v135_v46 = vadd.f32 %v134_v42, %v133_v36 }
  0x8c   :  { %v158_v45 = vadd.f32 %v157_v41, %v156_v35  ;;  %v142_v47 = vadd.f32 %v141_v43, %v140_v37 }
  0x8e   :  { %v171_v51 = vsel %vm170_vm2, %v158_v45, %v151_v44  ;;  %v246_v52 = vsel %vm170_vm2, %v142_v47, %v135_v46 }
  0x8f   :  { %545 = vmatmul.mubr.msk.f32.vlgmr.msra.gmra.mrb[0].mxu0 %vm128_vm1, %v171_v51  ;;  %556 = vmatmul.mubr.msk.f32.vlgmr.msra.gmra.mrb[0].mxu1 %vm128_vm1, %v246_v52 }
  0x90   :  { %594 = vmatpush3.bf16.msra.mxu0 %v593_v48  ;;  %566 = vmatprep.mubr.msk.f32.mxu0 %vm813_vm0, %v814_v1 }
  0x91   :  { %595 = vmatprep.subr.bf16.mxu0 %v812_v0  ;;  %577 = vmatprep.mubr.msk.f32.mxu1 %vm813_vm0, %v814_v1 }
  0x92   :  { %600 = vmatpush3.bf16.msra.mxu1 %v599_v57 }
  0x93   :  { %601 = vmatprep.subr.bf16.mxu1 %v812_v0  ;;  %v514_v0 = vld [vmem:[%s1018_s8] ss:$0 sm:$0xff] }
  0x94   :  { %597 = vmatpush3.bf16.msra.mxu0 %v596_v53 }
  0x96   :  { %603 = vmatpush3.bf16.msra.mxu1 %v602_v60 }
  0x97   :  { %567 = vmatmul.mubr.msk.f32.vlgmr.msra.gmra.mrb[2].mxu0 %vm128_vm1, %v159_v54 }
 0x162   :  { %v240_v61 = vpop.f32.mrb[0].mxu0  ;;  %v315_v62 = vpop.f32.mrb[0].mxu1 }
 0x163   :  { %v316_v63 = vadd.f32 %v315_v62, %v240_v61  ;;  %v546_v2 = vpop.f32.mrb[1].mxu0  ;;  %v557_v3 = vpop.f32.mrb[1].mxu1 }
 0x16a   :  { %v392_v1 = vpop.f32.mrb[2].mxu0 }
 0x16b   :  { %v396_v5 = vadd.f32 %v392_v1, %v316_v63  ;;  %v568_v6 = vpop.f32.mrb[3].mxu0 }
 0x16d   :  { %v404_v7 = vadd.f32 %v513_v4, %v396_v5 }
 0x16f   :  { %v405_v8 = vmax.f32 %v404_v7, 0.0 }
 0x171   :  { %578 = vmatmul.mubr.msk.f32.vlgmr.msra.gmra.mrb[2].mxu1 %vm128_vm1, %v405_v8 }
 0x244   :  { %v486_v9 = vpop.f32.mrb[2].mxu1 }
 0x245   :  { %v487_v10 = vadd.f32 %v514_v0, %v486_v9  ;;  %v579_v11 = vpop.f32.mrb[3].mxu1 }
 0x247   :  { %491 = vst.msk [vmem:[#allocation14] sm:$0x3] %vm490_vm3, %v487_v10 }
 0x248   :  { %782 = shalt.err (!%p779_p4)
}
 0x249   :  { %s783_s13 = scalar_lea.hbm %s1019_s9, 32 }
 0x24a   :  { %p784_p5 = scmp.ne.s32.totalorder %s1019_s9, %s783_s13  ;;  %p787_p6 = scmp.lt.u32.totalorder %s783_s13, %s1019_s9 }
 0x24c   :  { %p789_p7 = pnand %p787_p6, %p784_p5 }
 0x24e   :  { %792 = shalt.err (!%p789_p7)
}
 0x24f   :  { %501 = dma.vmem_to_hbm [thread:$0]  %s499_s29, 32, %s1019_s9, [#allocation4]  }
 0x250   :  { %801 = dma.done.wait [#allocation4], 32  }
 0x251   :  { %802 = vsyncadd [#allocation4], 4294967264 }
 0x252   :  { %505 = vsyncpa [#allocation3], 1 }
 0x253   :  { %506 = vsyncpa [#allocation6], 1 }
 0x254   :  { %507 = vsyncpa [#allocation9], 1 }
 0x255   :  { %508 = vsyncpa [#allocation12], 1 }
 0x256   :  { %509 = vsyncpa [#allocation4], 1 }

</bundles_post_ra>
